<compile_context>
chip_gen: v7x
topology: tpu7x:2x2x1
jax: 0.10.0
libtpu: 0.0.40
codegen_flags: <defaults>
</compile_context>

<pallas_src>
import functools

import jax
import jax.numpy as jnp
from jax.experimental import pallas as pl
from jax.experimental.pallas import tpu as pltpu


def _round_up(x, m):
    return (x + m - 1) // m * m


def _actor_kernel(max_action, action_dim,
                  x_ref, eps_ref,
                  w1_ref, b1_ref,
                  w2_ref, b2_ref,
                  w3_ref, b3_ref,
                  w4_ref, b4_ref,
                  logstd_ref,
                  a_out_ref, lp_out_ref):
    f32 = jnp.float32

    # fc1 -> relu   (single fused matmul over the concatenated s||g input)
    h = jnp.maximum(
        jnp.dot(x_ref[...], w1_ref[...], preferred_element_type=f32)
        + b1_ref[...], 0.0)
    # fc2 -> relu
    h = jnp.maximum(
        jnp.dot(h, w2_ref[...], preferred_element_type=f32) + b2_ref[...], 0.0)
    # fc3 -> relu
    h = jnp.maximum(
        jnp.dot(h, w3_ref[...], preferred_element_type=f32) + b3_ref[...], 0.0)
    # fc4 -> mean   (true action width; padded hidden rows of w4 are zero)
    mean = jnp.dot(h, w4_ref[...], preferred_element_type=f32) + b4_ref[...]

    log_std = logstd_ref[...]            # [1, A]
    std = jnp.exp(log_std)
    eps = eps_ref[...]                   # [TB, A]

    # rsample: a = mean + std * eps    (eps == 0  =>  deterministic, a = mean)
    a = mean + std * eps

    # Normal(mean, std).log_prob(a) summed over actions; (a - mean)/std == eps:
    #   log_pi_gauss = -0.5*sum(eps^2) - sum(log_std) - 0.5*A*log(2*pi)
    # tanh-squash correction: 2*(log(2) - a - softplus(-2a)).
    neg2a = -2.0 * a
    softplus = jnp.maximum(neg2a, 0.0) + jnp.log1p(jnp.exp(-jnp.abs(neg2a)))
    corr = 2.0 * (jnp.log(2.0) - a - softplus)

    per_lane = 0.5 * eps * eps + corr                        # [TB, A]
    logstd_sum = jnp.sum(log_std, axis=1, keepdims=True)     # [1, 1]
    log_pi = (-jnp.sum(per_lane, axis=1, keepdims=True)
              - logstd_sum
              - 0.5 * jnp.log(2.0 * jnp.pi) * action_dim)    # [TB, 1]

    # clamp AFTER the log-prob computation (matches the PyTorch code)
    a_clipped = jnp.clip(a, -max_action, max_action)

    a_out_ref[...] = a_clipped
    lp_out_ref[...] = log_pi


def init_params(key, state_dim, goal_dim, action_dim, hidden_dim):
    """Deterministic PyTorch-Linear-style init (uniform +/- 1/sqrt(fan_in))."""
    def linear(k, fan_in, fan_out):
        k_w, k_b = jax.random.split(k)
        bound = 1.0 / jnp.sqrt(fan_in)
        w = jax.random.uniform(k_w, (fan_in, fan_out), jnp.float32, -bound, bound)
        b = jax.random.uniform(k_b, (1, fan_out), jnp.float32, -bound, bound)
        return w, b

    k1, k2, k3, k4 = jax.random.split(key, 4)
    in_dim = state_dim + goal_dim
    w1, b1 = linear(k1, in_dim, hidden_dim)
    w2, b2 = linear(k2, hidden_dim, hidden_dim)
    w3, b3 = linear(k3, hidden_dim, hidden_dim)
    w4, b4 = linear(k4, hidden_dim, action_dim)
    return {
        "w1": w1, "b1": b1, "w2": w2, "b2": b2,
        "w3": w3, "b3": b3, "w4": w4, "b4": b4,
        "log_std": jnp.zeros((1, action_dim), jnp.float32),  # nn.Parameter(zeros)
    }


def prepare_params(params, state_dim, goal_dim, action_dim, hidden_dim):
    """One-time hidden-lane padding (multiple of 128); fc4/log_std unpadded."""
    HP = _round_up(max(hidden_dim, 1), 128)
    in_dim = state_dim + goal_dim

    def pad(x, rows, cols):
        return jnp.pad(x, ((0, rows - x.shape[0]), (0, cols - x.shape[1])))

    return {
        "w1": pad(params["w1"], in_dim, HP),
        "b1": pad(params["b1"], 1, HP),
        "w2": pad(params["w2"], HP, HP),
        "b2": pad(params["b2"], 1, HP),
        "w3": pad(params["w3"], HP, HP),
        "b3": pad(params["b3"], 1, HP),
        "w4": pad(params["w4"], HP, action_dim),
        "b4": params["b4"],
        "log_std": params["log_std"],
        "action_dim": int(action_dim),
        "in_dim": int(in_dim),
    }


def actor_forward(s, g, prepared, eps, max_action, *, tile_b=2048):
    """Pallas implementation of Actor.forward.

    s:   [B, state_dim] f32
    g:   [B, goal_dim]  f32
    eps: [B, action_dim] standard-normal noise (pass zeros for deterministic).
    Returns (a [B, action_dim], log_pi [B, 1]).
    """
    s = s.astype(jnp.float32)
    g = g.astype(jnp.float32)
    eps = eps.astype(jnp.float32)

    A = prepared["action_dim"]
    D_in = prepared["in_dim"]
    HP = prepared["w2"].shape[0]

    x = jnp.concatenate([s, g], axis=1)      # tiny [B, S+G] concat, one stream
    B = x.shape[0]

    # Tile choice: large tiles (low per-step overhead), but guarantee >= 2 grid
    # steps when B allows it so the "parallel" batch axis shards across both
    # v7x TensorCores and DMA/compute actually pipeline.
    half = _round_up(max(1, (B + 1) // 2), 8)
    TILE_B = min(tile_b, half)
    if TILE_B >= B:
        TILE_B = B                            # full-extent block (always legal)
    grid = (pl.cdiv(B, TILE_B),)

    batch = lambda i: (i, 0)       # blocked along the batch axis
    resident = lambda i: (0, 0)    # same block each step -> stays VMEM-resident

    kernel = functools.partial(_actor_kernel, float(max_action), int(A))

    # Advisory cost estimate + explicit VMEM limit (tiles are small; give the
    # double-buffered streams and resident weights generous headroom).
    weight_bytes = 4 * (D_in * HP + 2 * HP * HP + HP * A + 3 * HP + 2 * A + A)
    stream_bytes = 4 * TILE_B * (D_in + A + A + 1)
    vmem_limit = int(min(max(4 * stream_bytes + 2 * weight_bytes + (2 << 20),
                             8 << 20), 48 << 20))
    cost = pl.CostEstimate(
        flops=2 * B * (D_in * HP + 2 * HP * HP + HP * A),
        transcendentals=2 * B * A + A,
        bytes_accessed=4 * (B * (D_in + 2 * A + 1)) + weight_bytes,
    )

    a_out, log_pi = pl.pallas_call(
        kernel,
        out_shape=(jax.ShapeDtypeStruct((B, A), jnp.float32),
                   jax.ShapeDtypeStruct((B, 1), jnp.float32)),
        grid=grid,
        in_specs=[
            pl.BlockSpec((TILE_B, D_in), batch),   # x = s||g
            pl.BlockSpec((TILE_B, A), batch),      # eps (narrow stream)
            pl.BlockSpec((D_in, HP), resident),    # w1
            pl.BlockSpec((1, HP), resident),       # b1
            pl.BlockSpec((HP, HP), resident),      # w2
            pl.BlockSpec((1, HP), resident),       # b2
            pl.BlockSpec((HP, HP), resident),      # w3
            pl.BlockSpec((1, HP), resident),       # b3
            pl.BlockSpec((HP, A), resident),       # w4
            pl.BlockSpec((1, A), resident),        # b4
            pl.BlockSpec((1, A), resident),        # log_std
        ],
        out_specs=(pl.BlockSpec((TILE_B, A), batch),
                   pl.BlockSpec((TILE_B, 1), batch)),
        compiler_params=pltpu.CompilerParams(
            dimension_semantics=("parallel",),     # megacore sharding on v7x
            vmem_limit_bytes=vmem_limit),
        cost_estimate=cost,
    )(
        x, eps,
        prepared["w1"], prepared["b1"],
        prepared["w2"], prepared["b2"],
        prepared["w3"], prepared["b3"],
        prepared["w4"], prepared["b4"],
        prepared["log_std"],
    )
    return a_out, log_pi


def _reference_forward(s, g, params, eps, max_action):
    """Pure-JAX reference mirroring the PyTorch module, for a sanity check."""
    x = jnp.concatenate([s, g], axis=1)
    h = jax.nn.relu(x @ params["w1"] + params["b1"])
    h = jax.nn.relu(h @ params["w2"] + params["b2"])
    h = jax.nn.relu(h @ params["w3"] + params["b3"])
    mean = h @ params["w4"] + params["b4"]
    log_std = jnp.broadcast_to(params["log_std"], mean.shape)
    std = jnp.exp(log_std)
    a = mean + std * eps
    log_prob = -0.5 * ((a - mean) / std) ** 2 - log_std - 0.5 * jnp.log(2.0 * jnp.pi)
    log_pi = jnp.sum(log_prob, axis=1, keepdims=True)
    corr = 2.0 * (jnp.log(2.0) - a - jax.nn.softplus(-2.0 * a))
    log_pi = log_pi - jnp.sum(corr, axis=1, keepdims=True)
    return jnp.clip(a, -max_action, max_action), log_pi


if __name__ == "__main__":
    STATE_DIM, GOAL_DIM, ACTION_DIM, HIDDEN_DIM = 12, 4, 4, 32
    MAX_ACTION = 1.0
    BATCH = 8

    key = jax.random.PRNGKey(0)
    k_params, k_s, k_g, k_eps = jax.random.split(key, 4)

    params = init_params(k_params, STATE_DIM, GOAL_DIM, ACTION_DIM, HIDDEN_DIM)
    prepared = prepare_params(params, STATE_DIM, GOAL_DIM, ACTION_DIM, HIDDEN_DIM)

    s = jax.random.normal(k_s, (BATCH, STATE_DIM), jnp.float32)
    g = jax.random.normal(k_g, (BATCH, GOAL_DIM), jnp.float32)
    eps = jax.random.normal(k_eps, (BATCH, ACTION_DIM), jnp.float32)  # rsample noise

    # stochastic path
    a, log_pi = actor_forward(s, g, prepared, eps, MAX_ACTION)
    a, log_pi = jax.block_until_ready((a, log_pi))

    # deterministic path (eps = 0  <=>  a = mean)
    a_det, log_pi_det = actor_forward(
        s, g, prepared, jnp.zeros_like(eps), MAX_ACTION)
    jax.block_until_ready((a_det, log_pi_det))

    # sanity checks vs. pure-JAX reference (unpadded math)
    a_ref, lp_ref = _reference_forward(s, g, params, eps, MAX_ACTION)
    assert jnp.allclose(a, a_ref, atol=1e-4), "action mismatch"
    assert jnp.allclose(log_pi, lp_ref, atol=1e-3), "log_pi mismatch"

    a_ref_d, lp_ref_d = _reference_forward(
        s, g, params, jnp.zeros_like(eps), MAX_ACTION)
    assert jnp.allclose(a_det, a_ref_d, atol=1e-4), "det action mismatch"
    assert jnp.allclose(log_pi_det, lp_ref_d, atol=1e-3), "det log_pi mismatch"

    # also exercise a multi-grid-step batch (partial last tile)
    B2 = 24
    s2 = jax.random.normal(jax.random.PRNGKey(1), (B2, STATE_DIM), jnp.float32)
    g2 = jax.random.normal(jax.random.PRNGKey(2), (B2, GOAL_DIM), jnp.float32)
    e2 = jax.random.normal(jax.random.PRNGKey(3), (B2, ACTION_DIM), jnp.float32)
    a2, lp2 = actor_forward(s2, g2, prepared, e2, MAX_ACTION)
    jax.block_until_ready((a2, lp2))
    a2_ref, lp2_ref = _reference_forward(s2, g2, params, e2, MAX_ACTION)
    assert jnp.allclose(a2, a2_ref, atol=1e-4), "multi-tile action mismatch"
    assert jnp.allclose(lp2, lp2_ref, atol=1e-3), "multi-tile log_pi mismatch"

    print("KERNEL_OK")
</pallas_src>

<mosaic_0001>
module attributes {stable_mosaic.version = 11 : i64} {
  func.func @_actor_kernel(%arg0: i32, %arg1: memref<8x16xf32, #tpu.memory_space<vmem>>, %arg2: memref<8x4xf32, #tpu.memory_space<vmem>>, %arg3: memref<16x128xf32, #tpu.memory_space<vmem>>, %arg4: memref<1x128xf32, #tpu.memory_space<vmem>>, %arg5: memref<128x128xf32, #tpu.memory_space<vmem>>, %arg6: memref<1x128xf32, #tpu.memory_space<vmem>>, %arg7: memref<128x128xf32, #tpu.memory_space<vmem>>, %arg8: memref<1x128xf32, #tpu.memory_space<vmem>>, %arg9: memref<128x4xf32, #tpu.memory_space<vmem>>, %arg10: memref<1x4xf32, #tpu.memory_space<vmem>>, %arg11: memref<1x4xf32, #tpu.memory_space<vmem>>, %arg12: memref<8x4xf32, #tpu.memory_space<vmem>>, %arg13: memref<8x1xf32, #tpu.memory_space<vmem>>) attributes {dimension_semantics = [#tpu.dimension_semantics<parallel>], iteration_bounds = array<i64: 1>, scalar_prefetch = 0 : i64, scratch_operands = 0 : i64, tpu.core_type = #tpu.core_type<tc>, window_params = [{transform_indices = @transform_0, window_bounds = array<i64: 8, 16>}, {transform_indices = @transform_1, window_bounds = array<i64: 8, 4>}, {pipeline_mode = #tpu.pipeline_mode<synchronous>, transform_indices = @transform_2, window_bounds = array<i64: 16, 128>}, {pipeline_mode = #tpu.pipeline_mode<synchronous>, transform_indices = @transform_3, window_bounds = array<i64: 1, 128>}, {pipeline_mode = #tpu.pipeline_mode<synchronous>, transform_indices = @transform_4, window_bounds = array<i64: 128, 128>}, {pipeline_mode = #tpu.pipeline_mode<synchronous>, transform_indices = @transform_5, window_bounds = array<i64: 1, 128>}, {pipeline_mode = #tpu.pipeline_mode<synchronous>, transform_indices = @transform_6, window_bounds = array<i64: 128, 128>}, {pipeline_mode = #tpu.pipeline_mode<synchronous>, transform_indices = @transform_7, window_bounds = array<i64: 1, 128>}, {pipeline_mode = #tpu.pipeline_mode<synchronous>, transform_indices = @transform_8, window_bounds = array<i64: 128, 4>}, {pipeline_mode = #tpu.pipeline_mode<synchronous>, transform_indices = @transform_9, window_bounds = array<i64: 1, 4>}, {pipeline_mode = #tpu.pipeline_mode<synchronous>, transform_indices = @transform_10, window_bounds = array<i64: 1, 4>}, {transform_indices = @transform_11, window_bounds = array<i64: 8, 4>}, {transform_indices = @transform_12, window_bounds = array<i64: 8, 1>}]} {
    %c0 = arith.constant 0 : index
    %c0_0 = arith.constant 0 : index
    %0 = vector.load %arg1[%c0, %c0_0] : memref<8x16xf32, #tpu.memory_space<vmem>>, vector<8x16xf32>
    %c0_1 = arith.constant 0 : index
    %c0_2 = arith.constant 0 : index
    %1 = vector.load %arg3[%c0_1, %c0_2] : memref<16x128xf32, #tpu.memory_space<vmem>>, vector<16x128xf32>
    %cst = arith.constant dense<0.000000e+00> : vector<8x128xf32>
    %2 = tpu.matmul %0, %1, %cst {dimension_numbers = #tpu.dot_dimension_numbers<[1], [0], [0], [1], [0, 0, 1, 1], [], []>} : vector<8x16xf32>, vector<16x128xf32>, vector<8x128xf32> -> vector<8x128xf32>
    %c0_3 = arith.constant 0 : index
    %c0_4 = arith.constant 0 : index
    %3 = vector.load %arg4[%c0_3, %c0_4] : memref<1x128xf32, #tpu.memory_space<vmem>>, vector<1x128xf32>
    %4 = vector.broadcast %3 : vector<1x128xf32> to vector<8x128xf32>
    %5 = arith.addf %2, %4 : vector<8x128xf32>
    %cst_5 = arith.constant 0.000000e+00 : f32
    %6 = vector.broadcast %cst_5 : f32 to vector<8x128xf32>
    %7 = arith.maximumf %5, %6 : vector<8x128xf32>
    %c0_6 = arith.constant 0 : index
    %c0_7 = arith.constant 0 : index
    %8 = vector.load %arg5[%c0_6, %c0_7] : memref<128x128xf32, #tpu.memory_space<vmem>>, vector<128x128xf32>
    %cst_8 = arith.constant dense<0.000000e+00> : vector<8x128xf32>
    %9 = tpu.matmul %7, %8, %cst_8 {dimension_numbers = #tpu.dot_dimension_numbers<[1], [0], [0], [1], [0, 0, 1, 1], [], []>} : vector<8x128xf32>, vector<128x128xf32>, vector<8x128xf32> -> vector<8x128xf32>
    %c0_9 = arith.constant 0 : index
    %c0_10 = arith.constant 0 : index
    %10 = vector.load %arg6[%c0_9, %c0_10] : memref<1x128xf32, #tpu.memory_space<vmem>>, vector<1x128xf32>
    %11 = vector.broadcast %10 : vector<1x128xf32> to vector<8x128xf32>
    %12 = arith.addf %9, %11 : vector<8x128xf32>
    %cst_11 = arith.constant 0.000000e+00 : f32
    %13 = vector.broadcast %cst_11 : f32 to vector<8x128xf32>
    %14 = arith.maximumf %12, %13 : vector<8x128xf32>
    %c0_12 = arith.constant 0 : index
    %c0_13 = arith.constant 0 : index
    %15 = vector.load %arg7[%c0_12, %c0_13] : memref<128x128xf32, #tpu.memory_space<vmem>>, vector<128x128xf32>
    %cst_14 = arith.constant dense<0.000000e+00> : vector<8x128xf32>
    %16 = tpu.matmul %14, %15, %cst_14 {dimension_numbers = #tpu.dot_dimension_numbers<[1], [0], [0], [1], [0, 0, 1, 1], [], []>} : vector<8x128xf32>, vector<128x128xf32>, vector<8x128xf32> -> vector<8x128xf32>
    %c0_15 = arith.constant 0 : index
    %c0_16 = arith.constant 0 : index
    %17 = vector.load %arg8[%c0_15, %c0_16] : memref<1x128xf32, #tpu.memory_space<vmem>>, vector<1x128xf32>
    %18 = vector.broadcast %17 : vector<1x128xf32> to vector<8x128xf32>
    %19 = arith.addf %16, %18 : vector<8x128xf32>
    %cst_17 = arith.constant 0.000000e+00 : f32
    %20 = vector.broadcast %cst_17 : f32 to vector<8x128xf32>
    %21 = arith.maximumf %19, %20 : vector<8x128xf32>
    %c0_18 = arith.constant 0 : index
    %c0_19 = arith.constant 0 : index
    %22 = vector.load %arg9[%c0_18, %c0_19] : memref<128x4xf32, #tpu.memory_space<vmem>>, vector<128x4xf32>
    %cst_20 = arith.constant dense<0.000000e+00> : vector<8x4xf32>
    %23 = tpu.matmul %21, %22, %cst_20 {dimension_numbers = #tpu.dot_dimension_numbers<[1], [0], [0], [1], [0, 0, 1, 1], [], []>} : vector<8x128xf32>, vector<128x4xf32>, vector<8x4xf32> -> vector<8x4xf32>
    %c0_21 = arith.constant 0 : index
    %c0_22 = arith.constant 0 : index
    %24 = vector.load %arg10[%c0_21, %c0_22] : memref<1x4xf32, #tpu.memory_space<vmem>>, vector<1x4xf32>
    %25 = vector.broadcast %24 : vector<1x4xf32> to vector<8x4xf32>
    %26 = arith.addf %23, %25 : vector<8x4xf32>
    %c0_23 = arith.constant 0 : index
    %c0_24 = arith.constant 0 : index
    %27 = vector.load %arg11[%c0_23, %c0_24] : memref<1x4xf32, #tpu.memory_space<vmem>>, vector<1x4xf32>
    %28 = math.exp %27 : vector<1x4xf32>
    %c0_25 = arith.constant 0 : index
    %c0_26 = arith.constant 0 : index
    %29 = vector.load %arg2[%c0_25, %c0_26] : memref<8x4xf32, #tpu.memory_space<vmem>>, vector<8x4xf32>
    %30 = vector.broadcast %28 : vector<1x4xf32> to vector<8x4xf32>
    %31 = arith.mulf %30, %29 : vector<8x4xf32>
    %32 = arith.addf %26, %31 : vector<8x4xf32>
    %cst_27 = arith.constant -2.000000e+00 : f32
    %33 = vector.broadcast %cst_27 : f32 to vector<8x4xf32>
    %34 = arith.mulf %33, %32 : vector<8x4xf32>
    %cst_28 = arith.constant 0.000000e+00 : f32
    %35 = vector.broadcast %cst_28 : f32 to vector<8x4xf32>
    %36 = arith.maximumf %34, %35 : vector<8x4xf32>
    %37 = math.absf %34 : vector<8x4xf32>
    %cst_29 = arith.constant 0.000000e+00 : f32
    %38 = vector.broadcast %cst_29 : f32 to vector<8x4xf32>
    %39 = arith.subf %38, %37 : vector<8x4xf32>
    %40 = math.exp %39 : vector<8x4xf32>
    %41 = math.log1p %40 : vector<8x4xf32>
    %42 = arith.addf %36, %41 : vector<8x4xf32>
    %cst_30 = arith.constant 2.000000e+00 : f32
    %43 = math.log %cst_30 : f32
    %44 = vector.broadcast %43 : f32 to vector<8x4xf32>
    %45 = arith.subf %44, %32 : vector<8x4xf32>
    %46 = arith.subf %45, %42 : vector<8x4xf32>
    %cst_31 = arith.constant 2.000000e+00 : f32
    %47 = vector.broadcast %cst_31 : f32 to vector<8x4xf32>
    %48 = arith.mulf %47, %46 : vector<8x4xf32>
    %cst_32 = arith.constant 5.000000e-01 : f32
    %49 = vector.broadcast %cst_32 : f32 to vector<8x4xf32>
    %50 = arith.mulf %49, %29 : vector<8x4xf32>
    %51 = arith.mulf %50, %29 : vector<8x4xf32>
    %52 = arith.addf %51, %48 : vector<8x4xf32>
    %cst_33 = arith.constant dense<0.000000e+00> : vector<1xf32>
    %53 = vector.multi_reduction <add>, %27, %cst_33 [1] : vector<1x4xf32> to vector<1xf32>
    %54 = vector.shape_cast %53 : vector<1xf32> to vector<1x1xf32>
    %cst_34 = arith.constant dense<0.000000e+00> : vector<8xf32>
    %55 = vector.multi_reduction <add>, %52, %cst_34 [1] : vector<8x4xf32> to vector<8xf32>
    %56 = vector.shape_cast %55 : vector<8xf32> to vector<8x1xf32>
    %cst_35 = arith.constant 0.000000e+00 : f32
    %57 = vector.broadcast %cst_35 : f32 to vector<8x1xf32>
    %58 = arith.subf %57, %56 : vector<8x1xf32>
    %59 = vector.broadcast %54 : vector<1x1xf32> to vector<8x1xf32>
    %60 = arith.subf %58, %59 : vector<8x1xf32>
    %cst_36 = arith.constant 6.28318548 : f32
    %61 = math.log %cst_36 : f32
    %cst_37 = arith.constant 5.000000e-01 : f32
    %62 = arith.mulf %cst_37, %61 : f32
    %cst_38 = arith.constant 4.000000e+00 : f32
    %63 = arith.mulf %62, %cst_38 : f32
    %64 = vector.broadcast %63 : f32 to vector<8x1xf32>
    %65 = arith.subf %60, %64 : vector<8x1xf32>
    %cst_39 = arith.constant -1.000000e+00 : f32
    %cst_40 = arith.constant 1.000000e+00 : f32
    %66 = vector.broadcast %cst_39 : f32 to vector<8x4xf32>
    %67 = arith.maximumf %66, %32 : vector<8x4xf32>
    %68 = vector.broadcast %cst_40 : f32 to vector<8x4xf32>
    %69 = arith.minimumf %68, %67 : vector<8x4xf32>
    %c0_41 = arith.constant 0 : index
    %c0_42 = arith.constant 0 : index
    %70 = vector.load %arg12[%c0_41, %c0_42] : memref<8x4xf32, #tpu.memory_space<vmem>>, vector<8x4xf32>
    tpu.vector_store %arg12[%c0_41, %c0_42], %69 {strides = array<i32>} : memref<8x4xf32, #tpu.memory_space<vmem>>, vector<8x4xf32>,
    %c0_43 = arith.constant 0 : index
    %c0_44 = arith.constant 0 : index
    %71 = vector.load %arg13[%c0_43, %c0_44] : memref<8x1xf32, #tpu.memory_space<vmem>>, vector<8x1xf32>
    tpu.vector_store %arg13[%c0_43, %c0_44], %65 {strides = array<i32>} : memref<8x1xf32, #tpu.memory_space<vmem>>, vector<8x1xf32>,
    return
  }
  func.func @transform_0(%arg0: i32) -> (i32, i32) {
    %c0_i32 = arith.constant 0 : i32
    %c0_i32_0 = arith.constant 0 : i32
    return %arg0, %c0_i32 : i32, i32
  }
  func.func @transform_1(%arg0: i32) -> (i32, i32) {
    %c0_i32 = arith.constant 0 : i32
    %c0_i32_0 = arith.constant 0 : i32
    return %arg0, %c0_i32 : i32, i32
  }
  func.func @transform_2(%arg0: i32) -> (i32, i32) {
    %c0_i32 = arith.constant 0 : i32
    %c0_i32_0 = arith.constant 0 : i32
    %c0_i32_1 = arith.constant 0 : i32
    return %c0_i32, %c0_i32_0 : i32, i32
  }
  func.func @transform_3(%arg0: i32) -> (i32, i32) {
    %c0_i32 = arith.constant 0 : i32
    %c0_i32_0 = arith.constant 0 : i32
    %c0_i32_1 = arith.constant 0 : i32
    return %c0_i32, %c0_i32_0 : i32, i32
  }
  func.func @transform_4(%arg0: i32) -> (i32, i32) {
    %c0_i32 = arith.constant 0 : i32
    %c0_i32_0 = arith.constant 0 : i32
    %c0_i32_1 = arith.constant 0 : i32
    return %c0_i32, %c0_i32_0 : i32, i32
  }
  func.func @transform_5(%arg0: i32) -> (i32, i32) {
    %c0_i32 = arith.constant 0 : i32
    %c0_i32_0 = arith.constant 0 : i32
    %c0_i32_1 = arith.constant 0 : i32
    return %c0_i32, %c0_i32_0 : i32, i32
  }
  func.func @transform_6(%arg0: i32) -> (i32, i32) {
    %c0_i32 = arith.constant 0 : i32
    %c0_i32_0 = arith.constant 0 : i32
    %c0_i32_1 = arith.constant 0 : i32
    return %c0_i32, %c0_i32_0 : i32, i32
  }
  func.func @transform_7(%arg0: i32) -> (i32, i32) {
    %c0_i32 = arith.constant 0 : i32
    %c0_i32_0 = arith.constant 0 : i32
    %c0_i32_1 = arith.constant 0 : i32
    return %c0_i32, %c0_i32_0 : i32, i32
  }
  func.func @transform_8(%arg0: i32) -> (i32, i32) {
    %c0_i32 = arith.constant 0 : i32
    %c0_i32_0 = arith.constant 0 : i32
    %c0_i32_1 = arith.constant 0 : i32
    return %c0_i32, %c0_i32_0 : i32, i32
  }
  func.func @transform_9(%arg0: i32) -> (i32, i32) {
    %c0_i32 = arith.constant 0 : i32
    %c0_i32_0 = arith.constant 0 : i32
    %c0_i32_1 = arith.constant 0 : i32
    return %c0_i32, %c0_i32_0 : i32, i32
  }
  func.func @transform_10(%arg0: i32) -> (i32, i32) {
    %c0_i32 = arith.constant 0 : i32
    %c0_i32_0 = arith.constant 0 : i32
    %c0_i32_1 = arith.constant 0 : i32
    return %c0_i32, %c0_i32_0 : i32, i32
  }
  func.func @transform_11(%arg0: i32) -> (i32, i32) {
    %c0_i32 = arith.constant 0 : i32
    %c0_i32_0 = arith.constant 0 : i32
    return %arg0, %c0_i32 : i32, i32
  }
  func.func @transform_12(%arg0: i32) -> (i32, i32) {
    %c0_i32 = arith.constant 0 : i32
    %c0_i32_0 = arith.constant 0 : i32
    return %arg0, %c0_i32 : i32, i32
  }
}

</mosaic_0001>

<bundles_post_ra>
// kernel: tpu_custom_call.1
= control target key start
LH: loop header
LB: loop body
LE: loop exit
PB: predicated region body
PF: predicated region fallthrough
CT: control target
= control target key end

     0   :  { %18 = vsyncpa [#allocation3], 0  ;;  %s767_s21 = smov [#allocation2]   ;;  %s1014_s0 = inlined_call_operand.vmem [shape: f32[8,16], index: 0, kind: input, shape index: {}]   ;;  %s1015_s1 = inlined_call_operand.vmem [shape: f32[8,4], index: 1, kind: input, shape index: {}]   ;;  %s1016_s2 = inlined_call_operand.vmem [shape: f32[16,128], index: 2, kind: input, shape index: {}]   ;;  %s1017_s3 = inlined_call_operand.vmem [shape: f32[1,128], index: 3, kind: input, shape index: {}]   ;;  %s1018_s4 = inlined_call_operand.vmem [shape: f32[128,128], index: 4, kind: input, shape index: {}]   ;;  %s1019_s5 = inlined_call_operand.vmem [shape: f32[1,128], index: 5, kind: input, shape index: {}]   ;;  %s1020_s6 = inlined_call_operand.hbm [shape: f32[128,128], index: 6, kind: input, shape index: {}]   ;;  %s1021_s7 = inlined_call_operand.vmem [shape: f32[1,128], index: 7, kind: input, shape index: {}]   ;;  %s1022_s8 = inlined_call_operand.vmem [shape: f32[128,4], index: 8, kind: input, shape index: {}]   ;;  %s1023_s9 = inlined_call_operand.vmem [shape: f32[1,4], index: 9, kind: input, shape index: {}]   ;;  %s1024_s10 = inlined_call_operand.vmem [shape: f32[1,4], index: 10, kind: input, shape index: {}]   ;;  %s1025_s11 = inlined_call_operand.vmem [shape: f32[8,4], index: 11, kind: output, shape index: {0}]   ;;  %s1026_s12 = inlined_call_operand.vmem [shape: f32[8,1], index: 12, kind: output, shape index: {1}]  }
   0x1   :  { %s36_s22 = sshll.u32 %s767_s21, 4  ;;  %s743_s25 = scalar_lea.hbm %s1020_s6, 2048  ;;  %s37_s22 = int_to_ptr.vmem [resolvable:$true] %s36_s22 }
   0x2   :  { %p744_p0 = scmp.ne.s32.totalorder %s1020_s6, %s743_s25  ;;  %p747_p1 = scmp.lt.u32.totalorder %s743_s25, %s1020_s6 }
   0x4   :  { %p749_p2 = pnand %p747_p1, %p744_p0 }
   0x6   :  { %752 = shalt.err (!%p749_p2)
}
   0x7   :  { %s753_s30 = scalar_lea.vmem %s37_s22, 2048  ;;  %p758_p4 = scmp.lt.s32.totalorder %s37_s22, %s37_s22 }
   0x8   :  { %p754_p3 = scmp.ne.s32.totalorder %s37_s22, %s753_s30  ;;  %p759_p5 = scmp.lt.s32.totalorder %s753_s30, %s753_s30 }
   0xa   :  { %p760_p6 = por %p759_p5, %p758_p4 }
   0xc   :  { %p761_p7 = pnand %p760_p6, %p754_p3 }
   0xe   :  { %764 = shalt.err (!%p761_p7)
}
   0xf   :  { %s768_s13 = smov 128   ;;  %s769_s14 = smov 8  }
  0x10   :  { %42 = dma.hbm_to_vmem [thread:$0]  %s1020_s6, 2048, %s37_s22, [#allocation3], %s768_s13, %s768_s13, %s769_s14  }
  0x11   :  { %765 = dma.done.wait [#allocation3], 2048  }
  0x12   :  { %766 = vsyncadd [#allocation3], 4294965248  ;;  %v770_v0 = vmov 0.0|0.0   ;;  %vm771_vm0 = vmmov 0   ;;  %v772_v1 = vmov 0.0   ;;  %v55_v2 = vld [vmem:[%s1016_s2] sm:$0xff] }
  0x13   :  { %656 = vmatprep.subr.bf16.mxu0 %v770_v0  ;;  %548 = vmatprep.mubr.msk.f32.mxu0 %vm771_vm0, %v772_v1  ;;  %v56_v3 = vld [vmem:[%s1016_s2 + $0x8] sm:$0xff]  ;;  %v139_v5 = vld [vmem:[%s1018_s4] sm:$0xff]  ;;  %v141_v7 = vld [vmem:[%s1018_s4 + $0x10] sm:$0xff]  ;;  %vm64_vm1 = vcmask 130048   ;;  %vm454_vm2 = vcmask 24576   ;;  %vm458_vm3 = vcmask 31744  }
  0x14   :  { %659 = vmatprep.subr.bf16.mxu1 %v770_v0  ;;  %583 = vmatprep.mubr.msk.f32.mxu1 %vm771_vm0, %v772_v1  ;;  %v657_v4 = vpack.c.bf16 %v56_v3, %v55_v2  ;;  %v140_v6 = vld [vmem:[%s1018_s4 + $0x8] sm:$0xff]  ;;  %v142_v9 = vld [vmem:[%s1018_s4 + $0x18] sm:$0xff]  ;;  %v54_v10 = vld [vmem:[%s1014_s0] sm:$0xff]  ;;  %vm472_vm5 = vcmask 7168  }
  0x15   :  { %v660_v8 = vpack.c.bf16 %v140_v6, %v139_v5  ;;  %v663_v11 = vpack.c.bf16 %v142_v9, %v141_v7  ;;  %v143_v12 = vld [vmem:[%s1018_s4 + $0x20] sm:$0xff]  ;;  %v144_v13 = vld [vmem:[%s1018_s4 + $0x28] sm:$0xff]  ;;  %v145_v15 = vld [vmem:[%s1018_s4 + $0x30] sm:$0xff] }
  0x16   :  { %658 = vmatpush3.bf16.msra.mxu0 %v657_v4  ;;  %v666_v14 = vpack.c.bf16 %v144_v13, %v143_v12  ;;  %v146_v16 = vld [vmem:[%s1018_s4 + $0x38] sm:$0xff]  ;;  %v147_v18 = vld [vmem:[%s1018_s4 + $0x40] sm:$0xff]  ;;  %v148_v19 = vld [vmem:[%s1018_s4 + $0x48] sm:$0xff] }
  0x17   :  { %661 = vmatpush3.bf16.msra.mxu1 %v660_v8  ;;  %683 = vmatprep.subr.bf16.mxu0 %v770_v0  ;;  %v669_v17 = vpack.c.bf16 %v146_v16, %v145_v15  ;;  %v672_v20 = vpack.c.bf16 %v148_v19, %v147_v18  ;;  %v149_v21 = vld [vmem:[%s1018_s4 + $0x50] sm:$0xff]  ;;  %v150_v22 = vld [vmem:[%s1018_s4 + $0x58] sm:$0xff]  ;;  %v151_v24 = vld [vmem:[%s1018_s4 + $0x60] sm:$0xff] }
  0x18   :  { %662 = vmatprep.subr.bf16.mxu1 %v770_v0  ;;  %v675_v23 = vpack.c.bf16 %v150_v22, %v149_v21  ;;  %v152_v25 = vld [vmem:[%s1018_s4 + $0x68] sm:$0xff]  ;;  %v153_v27 = vld [vmem:[%s1018_s4 + $0x70] sm:$0xff]  ;;  %v154_v28 = vld [vmem:[%s1018_s4 + $0x78] sm:$0xff] }
  0x19   :  { %549 = vmatmul.mubr.msk.f32.vlgmr.msra.gmra.mrb[0].mxu0 %vm64_vm1, %v54_v10  ;;  %v678_v26 = vpack.c.bf16 %v152_v25, %v151_v24  ;;  %v681_v29 = vpack.c.bf16 %v154_v28, %v153_v27  ;;  %v233_v30 = vld [vmem:[#allocation2] sm:$0xff]  ;;  %v234_v31 = vld [vmem:[#allocation2 + $0x8] sm:$0xff]  ;;  %v235_v32 = vld [vmem:[#allocation2 + $0x10] sm:$0xff] }
  0x1a   :  { %618 = vmatprep.mubr.msk.f32.mxu0 %vm771_vm0, %v772_v1  ;;  %v684_v33 = vpack.c.bf16 %v234_v31, %v233_v30  ;;  %v236_v34 = vld [vmem:[#allocation2 + $0x18] sm:$0xff]  ;;  %v237_v36 = vld [vmem:[#allocation2 + $0x20] sm:$0xff]  ;;  %v238_v37 = vld [vmem:[#allocation2 + $0x28] sm:$0xff] }
  0x1b   :  { %664 = vmatpush3.bf16.msra.mxu1 %v663_v11  ;;  %v687_v35 = vpack.c.bf16 %v236_v34, %v235_v32  ;;  %v690_v38 = vpack.c.bf16 %v238_v37, %v237_v36  ;;  %v239_v39 = vld [vmem:[#allocation2 + $0x30] sm:$0xff]  ;;  %v240_v40 = vld [vmem:[#allocation2 + $0x38] sm:$0xff]  ;;  %v241_v42 = vld [vmem:[#allocation2 + $0x40] sm:$0xff]  ;;  %v425_v32 = vlaneseq }
  0x1c   :  { %665 = vmatprep.subr.bf16.mxu1 %v770_v0  ;;  %685 = vmatpush3.bf16.msra.mxu0 %v684_v33  ;;  %v693_v41 = vpack.c.bf16 %v240_v40, %v239_v39  ;;  %v242_v43 = vld [vmem:[#allocation2 + $0x48] sm:$0xff]  ;;  %v243_v45 = vld [vmem:[#allocation2 + $0x50] sm:$0xff]  ;;  %v244_v46 = vld [vmem:[#allocation2 + $0x58] sm:$0xff] }
  0x1d   :  { %686 = vmatprep.subr.bf16.mxu0 %v770_v0  ;;  %v696_v44 = vpack.c.bf16 %v242_v43, %v241_v42  ;;  %v699_v47 = vpack.c.bf16 %v244_v46, %v243_v45  ;;  %v245_v48 = vld [vmem:[#allocation2 + $0x60] sm:$0xff]  ;;  %v246_v49 = vld [vmem:[#allocation2 + $0x68] sm:$0xff]  ;;  %v247_v56 = vld [vmem:[#allocation2 + $0x70] sm:$0xff]  ;;  %v426_v33 = vshrl.u32 %v425_v32, 7 }
  0x1e   :  { %v702_v50 = vpack.c.bf16 %v246_v49, %v245_v48  ;;  %v483_v51 = vld [vmem:[%s1017_s3] ss:$0 sm:$0xff]  ;;  %v248_v57 = vld [vmem:[#allocation2 + $0x78] sm:$0xff]  ;;  %v328_v60 = vld [vmem:[%s1022_s8 + $0x8] sm:$0xff] }
  0x1f   :  { %667 = vmatpush3.bf16.msra.mxu1 %v666_v14  ;;  %v705_v58 = vpack.c.bf16 %v248_v57, %v247_v56  ;;  %v327_v59 = vld [vmem:[%s1022_s8] sm:$0xff]  ;;  %v329_v61 = vld [vmem:[%s1022_s8 + $0x10] sm:$0xff]  ;;  %v330_v63 = vld [vmem:[%s1022_s8 + $0x18] sm:$0xff]  ;;  %v427_v34 = vsub.s32 0, %v426_v33 }
  0x20   :  { %668 = vmatprep.subr.bf16.mxu1 %v770_v0  ;;  %688 = vmatpush3.bf16.msra.mxu0 %v687_v35  ;;  %v708_v62 = vpack.c.bf16 %v328_v60, %v327_v59  ;;  %v331_v2 = vld [vmem:[%s1022_s8 + $0x20] sm:$0xff]  ;;  %v332_v3 = vld [vmem:[%s1022_s8 + $0x28] sm:$0xff]  ;;  %v333_v5 = vld [vmem:[%s1022_s8 + $0x30] sm:$0xff] }
  0x21   :  { %689 = vmatprep.subr.bf16.mxu0 %v770_v0  ;;  %v714_v4 = vpack.c.bf16 %v332_v3, %v331_v2  ;;  %v334_v6 = vld [vmem:[%s1022_s8 + $0x38] sm:$0xff]  ;;  %v335_v8 = vld [vmem:[%s1022_s8 + $0x40] sm:$0xff]  ;;  %v336_v9 = vld [vmem:[%s1022_s8 + $0x48] sm:$0xff] }
  0x22   :  { %v717_v7 = vpack.c.bf16 %v334_v6, %v333_v5  ;;  %v720_v10 = vpack.c.bf16 %v336_v9, %v335_v8  ;;  %v337_v11 = vld [vmem:[%s1022_s8 + $0x50] sm:$0xff]  ;;  %v338_v12 = vld [vmem:[%s1022_s8 + $0x58] sm:$0xff]  ;;  %v339_v14 = vld [vmem:[%s1022_s8 + $0x60] sm:$0xff] }
  0x23   :  { %670 = vmatpush3.bf16.msra.mxu1 %v669_v17  ;;  %v723_v13 = vpack.c.bf16 %v338_v12, %v337_v11  ;;  %v340_v15 = vld [vmem:[%s1022_s8 + $0x68] sm:$0xff]  ;;  %v485_v17 = vld [vmem:[%s1019_s5] ss:$0 sm:$0xff]  ;;  %v341_v22 = vld [vmem:[%s1022_s8 + $0x70] sm:$0xff] }
  0x24   :  { %671 = vmatprep.subr.bf16.mxu1 %v770_v0  ;;  %691 = vmatpush3.bf16.msra.mxu0 %v690_v38  ;;  %v726_v16 = vpack.c.bf16 %v340_v15, %v339_v14  ;;  %v423_v37 = vld [vmem:[%s1015_s1] sm:$0xff] }
  0x25   :  { %692 = vmatprep.subr.bf16.mxu0 %v770_v0  ;;  %v487_v38 = vld [vmem:[%s1023_s9] ss:$0 sm:$0xff] }
  0x27   :  { %673 = vmatpush3.bf16.msra.mxu1 %v672_v20 }
  0x28   :  { %674 = vmatprep.subr.bf16.mxu1 %v770_v0  ;;  %694 = vmatpush3.bf16.msra.mxu0 %v693_v41 }
  0x29   :  { %695 = vmatprep.subr.bf16.mxu0 %v770_v0 }
  0x2b   :  { %676 = vmatpush3.bf16.msra.mxu1 %v675_v23  ;;  %v342_v23 = vld [vmem:[%s1022_s8 + $0x78] sm:$0xff] }
  0x2c   :  { %677 = vmatprep.subr.bf16.mxu1 %v770_v0  ;;  %697 = vmatpush3.bf16.msra.mxu0 %v696_v44  ;;  %v729_v24 = vpack.c.bf16 %v342_v23, %v341_v22 }
  0x2d   :  { %698 = vmatprep.subr.bf16.mxu0 %v770_v0 }
  0x2f   :  { %679 = vmatpush3.bf16.msra.mxu1 %v678_v26 }
  0x30   :  { %680 = vmatprep.subr.bf16.mxu1 %v770_v0  ;;  %700 = vmatpush3.bf16.msra.mxu0 %v699_v47 }
  0x31   :  { %701 = vmatprep.subr.bf16.mxu0 %v770_v0 }
  0x33   :  { %682 = vmatpush3.bf16.msra.mxu1 %v681_v29  ;;  %v420_v29 = vld [vmem:[%s1024_s10] sm:$0x1] }
  0x34   :  { %707 = vmatprep.subr.bf16.mxu1 %v770_v0  ;;  %703 = vmatpush3.bf16.msra.mxu0 %v702_v50  ;;  %v455_v30 = vsel %vm454_vm2, %v420_v29, 0.0  ;;  %v421_v31 = vmul.f32 1.442695, %v420_v29 }
  0x35   :  { %704 = vmatprep.subr.bf16.mxu0 %v770_v0  ;;  %456 = vadd.xlane.f32.xlu0 %v455_v30 }
  0x36   :  { %737 = vpow2.f32 %v421_v31 }
  0x38   :  { %706 = vmatpush3.bf16.msra.mxu0 %v705_v58  ;;  %v451_v58 = vmul.f32 0.5, %v423_v37 }
  0x40   :  { %v738_v35 = vpop.eup %737 }
  0x41   :  { %v428_v36 = vrot.slane %v738_v35, %v427_v34 }
  0x43   :  { %v430_v39 = vmul.f32 %v428_v36, %v423_v37 }
  0xec   :  { %v134_v52 = vpop.f32.mrb[0].mxu0 }
  0xed   :  { %v135_v53 = vadd.f32 %v483_v51, %v134_v52  ;;  %v550_v54 = vpop.f32.mrb[1].mxu0 }
  0xef   :  { %v138_v55 = vmax.f32 %v135_v53, 0.0 }
  0xf1   :  { %584 = vmatmul.mubr.f32.vlgmr.msra.gmra.mrb[0].mxu1 %v138_v55 }
  0xf2   :  { %653 = vmatprep.mubr.msk.f32.mxu1 %vm771_vm0, %v772_v1  ;;  %709 = vmatpush3.bf16.msra.mxu1 %v708_v62  ;;  %v711_v1 = vpack.c.bf16 %v330_v63, %v329_v61  ;;  %v452_v63 = vmul.f32 %v451_v58, %v423_v37 }
  0xf3   :  { %710 = vmatprep.subr.bf16.mxu1 %v770_v0 }
  0xf6   :  { %712 = vmatpush3.bf16.msra.mxu1 %v711_v1 }
  0xf7   :  { %713 = vmatprep.subr.bf16.mxu1 %v770_v0 }
  0xfa   :  { %715 = vmatpush3.bf16.msra.mxu1 %v714_v4  ;;  %v457_v4 = vpop.xlane.xlu0 %456 }
  0xfb   :  { %716 = vmatprep.subr.bf16.mxu1 %v770_v0  ;;  %v466_v6 = vrot.slane %v457_v4, %v427_v34 }
  0xfe   :  { %718 = vmatpush3.bf16.msra.mxu1 %v717_v7 }
  0xff   :  { %719 = vmatprep.subr.bf16.mxu1 %v770_v0 }
 0x102   :  { %721 = vmatpush3.bf16.msra.mxu1 %v720_v10 }
 0x103   :  { %722 = vmatprep.subr.bf16.mxu1 %v770_v0 }
 0x106   :  { %724 = vmatpush3.bf16.msra.mxu1 %v723_v13 }
 0x107   :  { %725 = vmatprep.subr.bf16.mxu1 %v770_v0 }
 0x10a   :  { %727 = vmatpush3.bf16.msra.mxu1 %v726_v16 }
 0x10b   :  { %728 = vmatprep.subr.bf16.mxu1 %v770_v0  ;;  %v486_v0 = vld [vmem:[%s1021_s7] ss:$0 sm:$0xff] }
 0x10e   :  { %730 = vmatpush3.bf16.msra.mxu1 %v729_v24 }
 0x1c4   :  { %v228_v18 = vpop.f32.mrb[0].mxu1 }
 0x1c5   :  { %v229_v19 = vadd.f32 %v485_v17, %v228_v18  ;;  %v585_v20 = vpop.f32.mrb[1].mxu1 }
 0x1c7   :  { %v232_v21 = vmax.f32 %v229_v19, 0.0 }
 0x1c9   :  { %619 = vmatmul.mubr.f32.vlgmr.msra.gmra.mrb[2].mxu0 %v232_v21 }
 0x29c   :  { %v322_v25 = vpop.f32.mrb[2].mxu0 }
 0x29d   :  { %v323_v26 = vadd.f32 %v486_v0, %v322_v25  ;;  %v620_v27 = vpop.f32.mrb[3].mxu0 }
 0x29f   :  { %v326_v28 = vmax.f32 %v323_v26, 0.0 }
 0x2a1   :  { %654 = vmatmul.mubr.f32.vlgmr.msra.gmra.mrb[2].mxu1 %v326_v28 }
 0x374   :  { %v416_v40 = vpop.f32.mrb[2].mxu1 }
 0x375   :  { %v417_v41 = vadd.f32 %v487_v38, %v416_v40  ;;  %v655_v42 = vpop.f32.mrb[3].mxu1 }
 0x377   :  { %v431_v43 = vadd.f32 %v430_v39, %v417_v41 }
 0x379   :  { %v432_v44 = vmul.f32 -2.0, %v431_v43  ;;  %v489_v45 = vclamps-f32 %v431_v43, 1.0  ;;  %v448_v61 = vsub.f32 0.6931472, %v431_v43 }
 0x37b   :  { %v434_v46 = vand.u32 2147483647, %v432_v44  ;;  %471 = vst.msk [vmem:[%s1025_s11] sm:$0xff] %vm458_vm3, %v489_v45  ;;  %v433_v57 = vmax.f32 %v432_v44, 0.0 }
 0x37d   :  { %v435_v47 = vsub.f32 0.0, %v434_v46 }
 0x37f   :  { %v436_v48 = vmul.f32 1.442695, %v435_v47 }
 0x381   :  { %739 = vpow2.f32 %v436_v48 }
 0x38b   :  { %v740_v49 = vpop.eup %739 }
 0x38c   :  { %v438_v50 = vadd.f32 1.0, %v740_v49  ;;  %v441_v51 = vmul.f32 -0.5, %v740_v49  ;;  %v444_v53 = vand.u32 2147483647, %v740_v49 }
 0x38e   :  { %741 = vlog2.f32 %v438_v50  ;;  %v442_v52 = vadd.f32 1.0, %v441_v51  ;;  %vm445_vm4 = vcmp.lt.f32.partialorder %v444_v53, 0.0004427343 }
 0x390   :  { %v443_v56 = vmul.f32 %v740_v49, %v442_v52 }
 0x398   :  { %v742_v54 = vpop.eup %741 }
 0x399   :  { %v440_v55 = vmul.f32 0.6931472, %v742_v54 }
 0x39b   :  { %v446_v59 = vsel %vm445_vm4, %v443_v56, %v440_v55 }
 0x39c   :  { %v447_v60 = vadd.f32 %v446_v59, %v433_v57 }
 0x39e   :  { %v449_v62 = vsub.f32 %v448_v61, %v447_v60 }
 0x3a0   :  { %v450_v1 = vmul.f32 2.0, %v449_v62 }
 0x3a2   :  { %v453_v2 = vadd.f32 %v452_v63, %v450_v1 }
 0x3a4   :  { %v459_v3 = vsel %vm458_vm3, %v453_v2, 0.0 }
 0x3a5   :  { %460 = vadd.xlane.f32.xlu0 %v459_v3 }
 0x432   :  { %v461_v5 = vpop.xlane.xlu0 %460 }
 0x433   :  { %v462_v7 = vsub.f32 0.0, %v461_v5 }
 0x435   :  { %v467_v8 = vsub.f32 %v462_v7, %v466_v6 }
 0x437   :  { %v488_v9 = vadd.f32 -3.675754, %v467_v8 }
 0x439   :  { %473 = vst.msk [vmem:[%s1026_s12] sm:$0xff] %vm472_vm5, %v488_v9 }
 0x43a   :  { %482 = vsyncpa [#allocation3], 1 }

</bundles_post_ra>
